<compile_context>
chip_gen: v7x
topology: tpu7x:2x2x1
jax: 0.10.0
libtpu: 0.0.40
codegen_flags: <defaults>
</compile_context>

<pallas_src>
import functools
import math

import jax
import jax.numpy as jnp
from jax.experimental import pallas as pl
from jax.experimental.pallas import tpu as pltpu


# ----------------------------------------------------------------------------
# Tunables
# ----------------------------------------------------------------------------
_DEFAULT_MIN_PALLAS_ELEMS = 1 << 16   # below ~256 KiB f32, jnp fallback is faster
_TARGET_TILE_BYTES = 1 << 20          # ~1 MiB per array per tile:
                                      # (N_in + 1) arrays x 2 pipeline buffers
                                      # stays well under v7x's 32 MiB scoped VMEM
_LANE_CHOICES = (1024, 512, 256, 128) # lane-dense widths (multiples of 128)


# ----------------------------------------------------------------------------
# 'add' kernel: elementwise sum over lane-dense 2D tiles
# ----------------------------------------------------------------------------
def _add_kernel(*refs):
    *in_refs, o_ref = refs
    # Accumulate in the natural (promoted) dtype: matches PyTorch sum(x)
    # semantics and keeps bf16 adds on the bf16 VPU path (v6e/v7x).
    acc = in_refs[0][...]
    for r in in_refs[1:]:
        acc = acc + r[...]
    o_ref[...] = acc.astype(o_ref.dtype)


def _pick_lanes(total):
    """Widest lane width (multiple of 128) dividing `total`; prefer >= 8 rows."""
    for lanes in _LANE_CHOICES:
        if total % lanes == 0 and total // lanes >= 8:
            return lanes
    for lanes in _LANE_CHOICES:
        if total % lanes == 0:
            return lanes
    return None


def _pallas_add(xs, out_dtype, alias_first):
    shape = xs[0].shape
    total = math.prod(shape)
    lanes = _pick_lanes(total)
    if lanes is None:
        return None  # not lane-divisible -> caller falls back to jnp

    rows = total // lanes
    flats = [x.reshape(rows, lanes) for x in xs]  # contiguous reshape: free

    itemsize = max(jnp.dtype(x.dtype).itemsize for x in xs)
    itemsize = max(itemsize, jnp.dtype(out_dtype).itemsize)

    if rows <= 8:
        tile_r = rows  # full-dim exemption from the (8, 128) rule
    else:
        tile_r = min(rows, max(8, _TARGET_TILE_BYTES // (lanes * itemsize)))
        tile_r = max(8, (tile_r // 8) * 8)  # keep sublane-aligned

    grid = (pl.cdiv(rows, tile_r),)
    spec = pl.BlockSpec((tile_r, lanes), lambda i: (i, 0))

    aliases = {}
    if alias_first and xs[0].dtype == jnp.dtype(out_dtype):
        aliases = {0: 0}  # reuse xs[0]'s buffer for the output

    fn = pl.pallas_call(
        _add_kernel,
        out_shape=jax.ShapeDtypeStruct((rows, lanes), out_dtype),
        grid=grid,
        in_specs=[spec] * len(xs),
        out_specs=spec,
        input_output_aliases=aliases,
        compiler_params=pltpu.CompilerParams(
            dimension_semantics=("parallel",),       # shard row tiles over v7x's 2 TCs
            vmem_limit_bytes=32 * 1024 * 1024,        # explicit; fits all generations
        ),
    )
    return fn(*flats).reshape(shape)


# ----------------------------------------------------------------------------
# 'cat' kernel: direct HBM->HBM DMA into channel offsets of the output
# ----------------------------------------------------------------------------
def _make_cat_dma_kernel(channel_sizes):
    offsets = []
    off = 0
    for c in channel_sizes:
        offsets.append(off)
        off += c
    n = len(channel_sizes)

    def kernel(*refs):
        in_refs = refs[:n]
        o_ref = refs[n]
        sems = refs[n + 1]
        copies = []
        # Issue all DMAs (they overlap), then wait for all of them.
        for idx, (r, start, c) in enumerate(zip(in_refs, offsets, channel_sizes)):
            cp = pltpu.make_async_copy(
                r, o_ref.at[:, start:start + c, :, :], sems.at[idx]
            )
            cp.start()
            copies.append(cp)
        for cp in copies:
            cp.wait()

    return kernel


def _pallas_cat(xs, out_dtype):
    b, _, h, w = xs[0].shape
    channel_sizes = tuple(int(x.shape[1]) for x in xs)
    c_total = sum(channel_sizes)
    # DMA is a bitwise copy: unify dtypes first (no-op when already equal).
    xs = [x.astype(out_dtype) for x in xs]

    fn = pl.pallas_call(
        _make_cat_dma_kernel(channel_sizes),
        out_shape=jax.ShapeDtypeStruct((b, c_total, h, w), out_dtype),
        in_specs=[pl.BlockSpec(memory_space=pl.ANY)] * len(xs),
        out_specs=pl.BlockSpec(memory_space=pl.ANY),
        scratch_shapes=[pltpu.SemaphoreType.DMA((len(xs),))],
    )
    return fn(*xs)


# ----------------------------------------------------------------------------
# MergeBlock wrapper
# ----------------------------------------------------------------------------
class MergeBlock:
    def __init__(self, policy, min_pallas_elements=_DEFAULT_MIN_PALLAS_ELEMS,
                 alias_first_input=False):
        if policy not in ["add", "cat"]:
            raise ValueError(
                "`merge_policy` must be one of: ['add', 'cat'], got {}".format(policy)
            )
        self.policy = policy
        self.min_pallas_elements = min_pallas_elements
        self.alias_first_input = alias_first_input

    def __call__(self, x):
        xs = [jnp.asarray(v) for v in x]
        if len(xs) == 1:
            return xs[0]
        out_dtype = functools.reduce(jnp.promote_types, (v.dtype for v in xs))

        if self.policy == "add":
            total = math.prod(xs[0].shape)
            if total >= self.min_pallas_elements:
                out = _pallas_add(xs, out_dtype, self.alias_first_input)
                if out is not None:
                    return out
            # Tiny / non-lane-divisible fallback: XLA fusion wins here.
            out = xs[0].astype(out_dtype)
            for v in xs[1:]:
                out = out + v
            return out.astype(out_dtype)

        # policy == 'cat'
        b, _, h, w = xs[0].shape
        total_out = b * sum(int(v.shape[1]) for v in xs) * h * w
        if total_out >= self.min_pallas_elements:
            return _pallas_cat(xs, out_dtype)
        return jnp.concatenate([v.astype(out_dtype) for v in xs], axis=1)


# ----------------------------------------------------------------------------
# Demo / self-test
# ----------------------------------------------------------------------------
if __name__ == "__main__":
    key = jax.random.PRNGKey(0)
    k1, k2, k3, k4, k5, k6, k7, k8 = jax.random.split(key, 8)

    # ---- 'add': small NCHW shapes, Pallas path forced (threshold 0) ----
    x_add = [
        jax.random.normal(k1, (2, 4, 16, 16), dtype=jnp.float32),
        jax.random.normal(k2, (2, 4, 16, 16), dtype=jnp.float32),
        jax.random.normal(k3, (2, 4, 16, 16), dtype=jnp.float32),
    ]
    add_block = MergeBlock("add", min_pallas_elements=0)
    y_add = jax.block_until_ready(add_block(x_add))
    ref_add = x_add[0] + x_add[1] + x_add[2]
    assert y_add.shape == (2, 4, 16, 16)
    assert jnp.allclose(y_add, ref_add, atol=1e-5, rtol=1e-5)

    # ---- 'add': medium shapes, default dispatch (Pallas, multi-tile grid) ----
    x_add_m = [
        jax.random.normal(k4, (4, 64, 64, 64), dtype=jnp.float32),
        jax.random.normal(k5, (4, 64, 64, 64), dtype=jnp.float32),
        jax.random.normal(k6, (4, 64, 64, 64), dtype=jnp.float32),
    ]
    add_block_m = MergeBlock("add")
    y_add_m = jax.block_until_ready(add_block_m(x_add_m))
    ref_add_m = x_add_m[0] + x_add_m[1] + x_add_m[2]
    assert y_add_m.shape == (4, 64, 64, 64)
    assert jnp.allclose(y_add_m, ref_add_m, atol=1e-5, rtol=1e-5)

    # ---- 'cat': differing channel counts, Pallas DMA path forced ----
    x_cat = [
        jax.random.normal(k7, (2, 4, 16, 16), dtype=jnp.float32),
        jax.random.normal(k8, (2, 3, 16, 16), dtype=jnp.float32),
        jax.random.normal(k1, (2, 5, 16, 16), dtype=jnp.float32),
    ]
    cat_block = MergeBlock("cat", min_pallas_elements=0)
    y_cat = jax.block_until_ready(cat_block(x_cat))
    ref_cat = jnp.concatenate(x_cat, axis=1)
    assert y_cat.shape == (2, 12, 16, 16)
    assert jnp.allclose(y_cat, ref_cat)

    # ---- small-size fallback paths (default threshold -> plain jnp) ----
    y_add_fb = jax.block_until_ready(MergeBlock("add")(x_add))
    assert jnp.allclose(y_add_fb, ref_add, atol=1e-5, rtol=1e-5)
    y_cat_fb = jax.block_until_ready(MergeBlock("cat")(x_cat))
    assert jnp.allclose(y_cat_fb, ref_cat)

    print("KERNEL_OK")
</pallas_src>

<mosaic_0001>
module attributes {stable_mosaic.version = 11 : i64} {
  func.func @_add_kernel(%arg0: i32, %arg1: memref<8x256xf32, #tpu.memory_space<vmem>>, %arg2: memref<8x256xf32, #tpu.memory_space<vmem>>, %arg3: memref<8x256xf32, #tpu.memory_space<vmem>>, %arg4: memref<8x256xf32, #tpu.memory_space<vmem>>) attributes {dimension_semantics = [#tpu.dimension_semantics<parallel>], iteration_bounds = array<i64: 1>, scalar_prefetch = 0 : i64, scratch_operands = 0 : i64, tpu.core_type = #tpu.core_type<tc>, window_params = [{transform_indices = @transform_0, window_bounds = array<i64: 8, 256>}, {transform_indices = @transform_1, window_bounds = array<i64: 8, 256>}, {transform_indices = @transform_2, window_bounds = array<i64: 8, 256>}, {transform_indices = @transform_3, window_bounds = array<i64: 8, 256>}]} {
    %c0 = arith.constant 0 : index
    %c0_0 = arith.constant 0 : index
    %0 = vector.load %arg1[%c0, %c0_0] : memref<8x256xf32, #tpu.memory_space<vmem>>, vector<8x256xf32>
    %c0_1 = arith.constant 0 : index
    %c0_2 = arith.constant 0 : index
    %1 = vector.load %arg2[%c0_1, %c0_2] : memref<8x256xf32, #tpu.memory_space<vmem>>, vector<8x256xf32>
    %2 = arith.addf %0, %1 : vector<8x256xf32>
    %c0_3 = arith.constant 0 : index
    %c0_4 = arith.constant 0 : index
    %3 = vector.load %arg3[%c0_3, %c0_4] : memref<8x256xf32, #tpu.memory_space<vmem>>, vector<8x256xf32>
    %4 = arith.addf %2, %3 : vector<8x256xf32>
    %c0_5 = arith.constant 0 : index
    %c0_6 = arith.constant 0 : index
    %5 = vector.load %arg4[%c0_5, %c0_6] : memref<8x256xf32, #tpu.memory_space<vmem>>, vector<8x256xf32>
    tpu.vector_store %arg4[%c0_5, %c0_6], %4 {strides = array<i32>} : memref<8x256xf32, #tpu.memory_space<vmem>>, vector<8x256xf32>,
    return
  }
  func.func @transform_0(%arg0: i32) -> (i32, i32) {
    %c0_i32 = arith.constant 0 : i32
    %c0_i32_0 = arith.constant 0 : i32
    return %arg0, %c0_i32 : i32, i32
  }
  func.func @transform_1(%arg0: i32) -> (i32, i32) {
    %c0_i32 = arith.constant 0 : i32
    %c0_i32_0 = arith.constant 0 : i32
    return %arg0, %c0_i32 : i32, i32
  }
  func.func @transform_2(%arg0: i32) -> (i32, i32) {
    %c0_i32 = arith.constant 0 : i32
    %c0_i32_0 = arith.constant 0 : i32
    return %arg0, %c0_i32 : i32, i32
  }
  func.func @transform_3(%arg0: i32) -> (i32, i32) {
    %c0_i32 = arith.constant 0 : i32
    %c0_i32_0 = arith.constant 0 : i32
    return %arg0, %c0_i32 : i32, i32
  }
}

</mosaic_0001>

<bundles_post_ra>
// kernel: tpu_custom_call.1
= control target key start
LH: loop header
LB: loop body
LE: loop exit
PB: predicated region body
PF: predicated region fallthrough
CT: control target
= control target key end

     0   :  { %8 = vsyncpa [#allocation3], 0  ;;  %s248_s0 = inlined_call_operand.hbm [shape: f32[8,256], index: 0, kind: input, shape index: {}]   ;;  %s249_s1 = inlined_call_operand.hbm [shape: f32[8,256], index: 1, kind: input, shape index: {}]   ;;  %s250_s2 = inlined_call_operand.hbm [shape: f32[8,256], index: 2, kind: input, shape index: {}]   ;;  %s251_s3 = inlined_call_operand.hbm [shape: f32[8,256], index: 3, kind: output, shape index: {}]  }
   0x1   :  { %9 = vsyncpa [#allocation6], 0 }
   0x2   :  { %10 = vsyncpa [#allocation4], 0  ;;  %s176_s12 = smov [#allocation5]   ;;  %s177_s14 = smov [#allocation2]  }
   0x3   :  { %s27_s13 = sshll.u32 %s176_s12, 4  ;;  %s17_s15 = sshll.u32 %s177_s14, 4  ;;  %s28_s13 = int_to_ptr.vmem [resolvable:$true] %s27_s13  ;;  %s18_s15 = int_to_ptr.vmem [resolvable:$true] %s17_s15 }
   0x4   :  { %s82_s18 = scalar_lea.hbm %s249_s1, 256 }
   0x5   :  { %p83_p0 = scmp.ne.s32.totalorder %s249_s1, %s82_s18  ;;  %p86_p1 = scmp.lt.u32.totalorder %s82_s18, %s249_s1 }
   0x7   :  { %p88_p2 = pnand %p86_p1, %p83_p0 }
   0x9   :  { %91 = shalt.err (!%p88_p2)
}
   0xa   :  { %s92_s23 = scalar_lea.vmem %s28_s13, 256  ;;  %p97_p4 = scmp.lt.s32.totalorder %s28_s13, %s28_s13 }
   0xb   :  { %p93_p3 = scmp.ne.s32.totalorder %s28_s13, %s92_s23  ;;  %p98_p5 = scmp.lt.s32.totalorder %s92_s23, %s92_s23 }
   0xd   :  { %p99_p6 = por %p98_p5, %p97_p4 }
   0xf   :  { %p100_p7 = pnand %p99_p6, %p93_p3 }
  0x11   :  { %103 = shalt.err (!%p100_p7)
}
  0x12   :  { %30 = dma.hbm_to_vmem [thread:$0]  %s249_s1, 256, %s28_s13, [#allocation6]  }
  0x13   :  { %s104_s28 = scalar_lea.hbm %s248_s0, 256 }
  0x14   :  { %p105_p8 = scmp.ne.s32.totalorder %s248_s0, %s104_s28  ;;  %p108_p9 = scmp.lt.u32.totalorder %s104_s28, %s248_s0 }
  0x16   :  { %p110_p10 = pnand %p108_p9, %p105_p8 }
  0x18   :  { %113 = shalt.err (!%p110_p10)
}
  0x19   :  { %s114_s6 = scalar_lea.vmem %s18_s15, 256  ;;  %p119_p12 = scmp.lt.s32.totalorder %s18_s15, %s18_s15 }
  0x1a   :  { %p115_p11 = scmp.ne.s32.totalorder %s18_s15, %s114_s6  ;;  %p120_p13 = scmp.lt.s32.totalorder %s114_s6, %s114_s6 }
  0x1c   :  { %p121_p0 = por %p120_p13, %p119_p12 }
  0x1e   :  { %p122_p1 = pnand %p121_p0, %p115_p11 }
  0x20   :  { %125 = shalt.err (!%p122_p1)
}
  0x21   :  { %20 = dma.hbm_to_vmem [thread:$0]  %s248_s0, 256, %s18_s15, [#allocation3]  }
  0x22   :  { %s178_s8 = smov [#allocation7]   ;;  %s126_s12 = scalar_lea.hbm %s250_s2, 256 }
  0x23   :  { %s37_s9 = sshll.u32 %s178_s8, 4  ;;  %p127_p2 = scmp.ne.s32.totalorder %s250_s2, %s126_s12  ;;  %s38_s9 = int_to_ptr.vmem [resolvable:$true] %s37_s9 }
  0x24   :  { %p130_p3 = scmp.lt.u32.totalorder %s126_s12, %s250_s2 }
  0x26   :  { %p132_p4 = pnand %p130_p3, %p127_p2 }
  0x28   :  { %135 = shalt.err (!%p132_p4)
}
  0x29   :  { %s136_s18 = scalar_lea.vmem %s38_s9, 256  ;;  %p141_p6 = scmp.lt.s32.totalorder %s38_s9, %s38_s9 }
  0x2a   :  { %p137_p5 = scmp.ne.s32.totalorder %s38_s9, %s136_s18  ;;  %p142_p7 = scmp.lt.s32.totalorder %s136_s18, %s136_s18 }
  0x2c   :  { %p143_p8 = por %p142_p7, %p141_p6 }
  0x2e   :  { %p144_p9 = pnand %p143_p8, %p137_p5 }
  0x30   :  { %147 = shalt.err (!%p144_p9)
}
  0x31   :  { %40 = dma.hbm_to_vmem [thread:$0]  %s250_s2, 256, %s38_s9, [#allocation6]  }
  0x32   :  { %170 = dma.done.wait [#allocation3], 256  }
  0x33   :  { %171 = vsyncadd [#allocation3], 4294967040 }
  0x34   :  { %172 = dma.done.wait [#allocation6], 512  }
  0x35   :  { %173 = vsyncadd [#allocation6], 4294966784  ;;  %v50_v0 = vld [vmem:[#allocation2] sm:$0xff]  ;;  %v52_v1 = vld [vmem:[#allocation5] sm:$0xff]  ;;  %s179_s19 = smov [#allocation8]  }
  0x36   :  { %v56_v2 = vld [vmem:[#allocation7] sm:$0xff]  ;;  %v54_v3 = vadd.f32 %v52_v1, %v50_v0  ;;  %v51_v4 = vld [vmem:[#allocation2 + $0x8] sm:$0xff]  ;;  %v53_v5 = vld [vmem:[#allocation5 + $0x8] sm:$0xff]  ;;  %s68_s20 = sshll.u32 %s179_s19, 4  ;;  %s69_s20 = int_to_ptr.vmem [resolvable:$true] %s68_s20 }
  0x37   :  { %v57_v6 = vld [vmem:[#allocation7 + $0x8] sm:$0xff]  ;;  %v55_v7 = vadd.f32 %v53_v5, %v51_v4  ;;  %s148_s2 = scalar_lea.vmem %s69_s20, 256  ;;  %p153_p11 = scmp.lt.s32.totalorder %s69_s20, %s69_s20 }
  0x38   :  { %v58_v8 = vadd.f32 %v56_v2, %v54_v3  ;;  %p149_p10 = scmp.ne.s32.totalorder %s69_s20, %s148_s2  ;;  %p154_p12 = scmp.lt.s32.totalorder %s148_s2, %s148_s2 }
  0x39   :  { %v59_v9 = vadd.f32 %v57_v6, %v55_v7 }
  0x3a   :  { %60 = vst [vmem:[#allocation8] sm:$0xff] %v58_v8  ;;  %p155_p13 = por %p154_p12, %p153_p11 }
  0x3b   :  { %61 = vst [vmem:[#allocation8 + $0x8] sm:$0xff] %v59_v9 }
  0x3c   :  { %p156_p0 = pnand %p155_p13, %p149_p10 }
  0x3e   :  { %159 = shalt.err (!%p156_p0)
}
  0x3f   :  { %s160_s23 = scalar_lea.hbm %s251_s3, 256 }
  0x40   :  { %p161_p1 = scmp.ne.s32.totalorder %s251_s3, %s160_s23  ;;  %p164_p2 = scmp.lt.u32.totalorder %s160_s23, %s251_s3 }
  0x42   :  { %p166_p3 = pnand %p164_p2, %p161_p1 }
  0x44   :  { %169 = shalt.err (!%p166_p3)
}
  0x45   :  { %71 = dma.vmem_to_hbm [thread:$0]  %s69_s20, 256, %s251_s3, [#allocation4]  }
  0x46   :  { %174 = dma.done.wait [#allocation4], 256  }
  0x47   :  { %175 = vsyncadd [#allocation4], 4294967040 }
  0x48   :  { %75 = vsyncpa [#allocation3], 1 }
  0x49   :  { %76 = vsyncpa [#allocation6], 1 }
  0x4a   :  { %77 = vsyncpa [#allocation4], 1 }

</bundles_post_ra>
